<compile_context>
chip_gen: v6e
topology: v6e:2x2x1
jax: 0.10.0
libtpu: 0.0.40
codegen_flags: <defaults>
</compile_context>

<pallas_src>
import math

import jax
import jax.numpy as jnp
import numpy as np
from jax.experimental import pallas as pl
from jax.experimental.pallas import tpu as pltpu

EMBEDDING_DIM = 2
HIDDEN_DIM = 2
sentences = ['i like apple', 'i love banana', 'i hate rat']
word_list = list(set(' '.join(sentences).split()))
VOCAB_SIZE = len(word_list)  # 7


def lstm_lm_kernel(gx_ref, p_ref, out_ref):
    """LSTM recurrence + FC head, all VPU/EUP, single invocation.

    gx_ref : (T, B, 4H)  pre-activations x @ W_ih^T + b_ih + b_hh,
                         gate order [i, f, g, o] along the last (lane) axis
    p_ref  : (2H+1, P)   rows [0:H]   = W_hh^T   (H, 4H)
                         rows [H:2H]  = W_fc^T   (H, V)  (lane-padded to P)
                         row  [2H]    = b_fc     (V,)    (lane-padded to P)
    out_ref: (B, V)      logits
    """
    gx = gx_ref[...]                     # (T, B, 4H) f32
    p = p_ref[...]                       # (2H+1, P)  f32

    T, B, H4 = gx.shape
    H = H4 // 4
    V = out_ref.shape[1]

    # Loop-invariant views / constants, hoisted off the serial chain.
    w_hh_rows = [p[j:j + 1, 0:H4] for j in range(H)]            # each (1, 4H)
    w_fc_rows = [p[H + j:H + j + 1, 0:V] for j in range(H)]     # each (1, V)
    b_fc = p[2 * H:2 * H + 1, 0:V]                              # (1, V)
    lane = jax.lax.broadcasted_iota(jnp.int32, (B, H4), 1)
    g_mask = (lane >= 2 * H) & (lane < 3 * H)                   # g-gate lanes -> tanh

    h = jnp.zeros((B, H), jnp.float32)
    c = jnp.zeros((B, H), jnp.float32)

    # T is tiny and static -> unroll the sequential recurrence. Per step only
    # H broadcast FMAs (h @ W_hh^T) + 3 whole-vreg EUP pushes remain on the
    # critical path.
    for t in range(T):
        pre = gx[t]                                             # (B, 4H), free view
        for j in range(H):
            pre = pre + h[:, j:j + 1] * w_hh_rows[j]
        sg = jax.nn.sigmoid(pre)                                # 1 EUP push, whole vreg
        th = jnp.tanh(pre)                                      # 1 EUP push, whole vreg
        act = jnp.where(g_mask, th, sg)                         # i | f | tanh(g) | o
        i_g = act[:, 0 * H:1 * H]
        f_g = act[:, 1 * H:2 * H]
        g_g = act[:, 2 * H:3 * H]
        o_g = act[:, 3 * H:4 * H]
        c = f_g * c + i_g * g_g
        h = o_g * jnp.tanh(c)                                   # 1 EUP push

    # FC head on the VPU: logits = h @ W_fc^T + b_fc.
    logits = jnp.broadcast_to(b_fc, (B, V))
    for j in range(H):
        logits = logits + h[:, j:j + 1] * w_fc_rows[j]
    out_ref[...] = logits.astype(out_ref.dtype)


def init_params(key):
    """Deterministic parameter init matching the PyTorch module's shapes."""
    ks = jax.random.split(key, 7)
    k_lstm = 1.0 / math.sqrt(HIDDEN_DIM)
    k_fc = 1.0 / math.sqrt(HIDDEN_DIM)
    params = {
        "embed": jax.random.normal(ks[0], (VOCAB_SIZE, EMBEDDING_DIM), jnp.float32),
        # PyTorch LSTM layout: (4H, E) / (4H, H), gate order [i, f, g, o]
        "w_ih": jax.random.uniform(ks[1], (4 * HIDDEN_DIM, EMBEDDING_DIM),
                                   jnp.float32, -k_lstm, k_lstm),
        "w_hh": jax.random.uniform(ks[2], (4 * HIDDEN_DIM, HIDDEN_DIM),
                                   jnp.float32, -k_lstm, k_lstm),
        "b_ih": jax.random.uniform(ks[3], (4 * HIDDEN_DIM,), jnp.float32,
                                   -k_lstm, k_lstm),
        "b_hh": jax.random.uniform(ks[4], (4 * HIDDEN_DIM,), jnp.float32,
                                   -k_lstm, k_lstm),
        # PyTorch Linear: (V, H) weight, (V,) bias
        "w_fc": jax.random.uniform(ks[5], (VOCAB_SIZE, HIDDEN_DIM),
                                   jnp.float32, -k_fc, k_fc),
        "b_fc": jax.random.uniform(ks[6], (VOCAB_SIZE,), jnp.float32,
                                   -k_fc, k_fc),
    }
    return params


def pack_params(params):
    """One-time parameter packing, hoisted out of the per-call path.

    * proj_table[v] = embed[v] @ W_ih^T + b_ih + b_hh   -> (V, 4H), gate order [i,f,g,o]
      (folds the embedding gather, input projection and both biases together)
    * slab          = [W_hh^T ; W_fc^T (padded) ; b_fc (padded)] -> (2H+1, max(4H, V))
    """
    V, _E = params["embed"].shape
    H = HIDDEN_DIM
    proj_table = (params["embed"] @ params["w_ih"].T
                  + params["b_ih"] + params["b_hh"]).astype(jnp.float32)   # (V, 4H)
    P = max(4 * H, V)
    slab = jnp.zeros((2 * H + 1, P), jnp.float32)
    slab = slab.at[0:H, 0:4 * H].set(params["w_hh"].T)        # W_hh^T  (H, 4H)
    slab = slab.at[H:2 * H, 0:V].set(params["w_fc"].T)        # W_fc^T  (H, V)
    slab = slab.at[2 * H, 0:V].set(params["b_fc"])            # b_fc    (V,)
    return {"proj_table": proj_table, "slab": slab}


@jax.jit
def lstm_lm_forward(x_ids, proj_table, slab):
    """Per-call glue: one gather (in (T, B, 4H) layout) + one pallas_call."""
    B, T = x_ids.shape
    V = VOCAB_SIZE
    # TODO(synk): at realistic V/E/T, fuse this gather into the kernel via
    # PrefetchScalarGridSpec scalar-prefetched token ids; at this size the
    # single XLA gather is cheaper than any extra grid machinery.
    gx = proj_table[x_ids.T]                                   # (T, B, 4H)
    out = pl.pallas_call(
        lstm_lm_kernel,
        out_shape=jax.ShapeDtypeStruct((B, V), jnp.float32),
        in_specs=[
            pl.BlockSpec(memory_space=pltpu.MemorySpace.VMEM),
            pl.BlockSpec(memory_space=pltpu.MemorySpace.VMEM),
        ],
        out_specs=pl.BlockSpec(memory_space=pltpu.MemorySpace.VMEM),
    )(gx, slab)
    return out                                                 # (B, V)


def _reference_forward(x_ids, params):
    """Pure-JAX reference reproducing nn.Embedding -> nn.LSTM -> fc."""
    x = params["embed"][x_ids]
    B, T, _ = x.shape
    H = HIDDEN_DIM
    h = jnp.zeros((B, H), jnp.float32)
    c = jnp.zeros((B, H), jnp.float32)
    for t in range(T):
        gates = x[:, t, :] @ params["w_ih"].T + params["b_ih"] \
            + h @ params["w_hh"].T + params["b_hh"]
        i_g = jax.nn.sigmoid(gates[:, 0 * H:1 * H])
        f_g = jax.nn.sigmoid(gates[:, 1 * H:2 * H])
        g_g = jnp.tanh(gates[:, 2 * H:3 * H])
        o_g = jax.nn.sigmoid(gates[:, 3 * H:4 * H])
        c = f_g * c + i_g * g_g
        h = o_g * jnp.tanh(c)
    return h @ params["w_fc"].T + params["b_fc"]


if __name__ == "__main__":
    key = jax.random.PRNGKey(0)
    pkey, xkey = jax.random.split(key)
    params = init_params(pkey)
    packed = pack_params(params)        # one-time; NOT in the per-call path

    B, T = 2, 8
    x_ids = jax.random.randint(xkey, (B, T), 0, VOCAB_SIZE, dtype=jnp.int32)

    logits = jax.block_until_ready(
        lstm_lm_forward(x_ids, packed["proj_table"], packed["slab"]))
    ref = jax.block_until_ready(_reference_forward(x_ids, params))

    np.testing.assert_allclose(np.asarray(logits), np.asarray(ref),
                               rtol=1e-5, atol=1e-5)
    assert logits.shape == (B, VOCAB_SIZE)
    print("KERNEL_OK")
</pallas_src>

<mosaic_0001>
module attributes {stable_mosaic.version = 11 : i64} {
  func.func @lstm_lm_kernel(%arg0: memref<8x2x8xf32, #tpu.memory_space<vmem>>, %arg1: memref<5x8xf32, #tpu.memory_space<vmem>>, %arg2: memref<2x7xf32, #tpu.memory_space<vmem>>) attributes {dimension_semantics = [], scalar_prefetch = 0 : i64, scratch_operands = 0 : i64, tpu.core_type = #tpu.core_type<tc>} {
    %c0 = arith.constant 0 : index
    %c0_0 = arith.constant 0 : index
    %c0_1 = arith.constant 0 : index
    %0 = vector.load %arg0[%c0, %c0_0, %c0_1] : memref<8x2x8xf32, #tpu.memory_space<vmem>>, vector<8x2x8xf32>
    %c0_2 = arith.constant 0 : index
    %c0_3 = arith.constant 0 : index
    %1 = vector.load %arg1[%c0_2, %c0_3] : memref<5x8xf32, #tpu.memory_space<vmem>>, vector<5x8xf32>
    %2 = vector.extract_strided_slice %1 {offsets = [0, 0], sizes = [1, 8], strides = [1, 1]} : vector<5x8xf32> to vector<1x8xf32>
    %3 = vector.extract_strided_slice %1 {offsets = [1, 0], sizes = [1, 8], strides = [1, 1]} : vector<5x8xf32> to vector<1x8xf32>
    %4 = vector.extract_strided_slice %1 {offsets = [2, 0], sizes = [1, 7], strides = [1, 1]} : vector<5x8xf32> to vector<1x7xf32>
    %5 = vector.extract_strided_slice %1 {offsets = [3, 0], sizes = [1, 7], strides = [1, 1]} : vector<5x8xf32> to vector<1x7xf32>
    %6 = vector.extract_strided_slice %1 {offsets = [4, 0], sizes = [1, 7], strides = [1, 1]} : vector<5x8xf32> to vector<1x7xf32>
    %7 = tpu.iota {dimensions = array<i32: 1>} : vector<2x8xi32>
    %c4_i32 = arith.constant 4 : i32
    %8 = vector.broadcast %c4_i32 : i32 to vector<2x8xi32>
    %9 = arith.cmpi sge, %7, %8 : vector<2x8xi32>
    %c6_i32 = arith.constant 6 : i32
    %10 = vector.broadcast %c6_i32 : i32 to vector<2x8xi32>
    %11 = arith.cmpi slt, %7, %10 : vector<2x8xi32>
    %12 = arith.andi %9, %11 : vector<2x8xi1>
    %cst = arith.constant 0.000000e+00 : f32
    %13 = vector.broadcast %cst : f32 to vector<2x2xf32>
    %cst_4 = arith.constant 0.000000e+00 : f32
    %14 = vector.broadcast %cst_4 : f32 to vector<2x2xf32>
    %15 = vector.extract_strided_slice %0 {offsets = [0, 0, 0], sizes = [1, 2, 8], strides = [1, 1, 1]} : vector<8x2x8xf32> to vector<1x2x8xf32>
    %16 = vector.shape_cast %15 : vector<1x2x8xf32> to vector<2x8xf32>
    %17 = vector.extract_strided_slice %13 {offsets = [0, 0], sizes = [2, 1], strides = [1, 1]} : vector<2x2xf32> to vector<2x1xf32>
    %18 = vector.broadcast %17 : vector<2x1xf32> to vector<2x8xf32>
    %19 = vector.broadcast %2 : vector<1x8xf32> to vector<2x8xf32>
    %20 = arith.mulf %18, %19 : vector<2x8xf32>
    %21 = arith.addf %16, %20 : vector<2x8xf32>
    %22 = vector.extract_strided_slice %13 {offsets = [0, 1], sizes = [2, 1], strides = [1, 1]} : vector<2x2xf32> to vector<2x1xf32>
    %23 = vector.broadcast %22 : vector<2x1xf32> to vector<2x8xf32>
    %24 = vector.broadcast %3 : vector<1x8xf32> to vector<2x8xf32>
    %25 = arith.mulf %23, %24 : vector<2x8xf32>
    %26 = arith.addf %21, %25 : vector<2x8xf32>
    %27 = arith.negf %26 : vector<2x8xf32>
    %28 = math.exp %27 : vector<2x8xf32>
    %cst_5 = arith.constant 1.000000e+00 : f32
    %29 = vector.broadcast %cst_5 : f32 to vector<2x8xf32>
    %30 = arith.addf %29, %28 : vector<2x8xf32>
    %31 = arith.divf %29, %30 : vector<2x8xf32>
    %32 = math.tanh %26 : vector<2x8xf32>
    %33 = arith.select %12, %32, %31 : vector<2x8xi1>, vector<2x8xf32>
    %34 = vector.extract_strided_slice %33 {offsets = [0, 0], sizes = [2, 2], strides = [1, 1]} : vector<2x8xf32> to vector<2x2xf32>
    %35 = vector.extract_strided_slice %33 {offsets = [0, 2], sizes = [2, 2], strides = [1, 1]} : vector<2x8xf32> to vector<2x2xf32>
    %36 = vector.extract_strided_slice %33 {offsets = [0, 4], sizes = [2, 2], strides = [1, 1]} : vector<2x8xf32> to vector<2x2xf32>
    %37 = vector.extract_strided_slice %33 {offsets = [0, 6], sizes = [2, 2], strides = [1, 1]} : vector<2x8xf32> to vector<2x2xf32>
    %38 = arith.mulf %35, %14 : vector<2x2xf32>
    %39 = arith.mulf %34, %36 : vector<2x2xf32>
    %40 = arith.addf %38, %39 : vector<2x2xf32>
    %41 = math.tanh %40 : vector<2x2xf32>
    %42 = arith.mulf %37, %41 : vector<2x2xf32>
    %43 = vector.extract_strided_slice %0 {offsets = [1, 0, 0], sizes = [1, 2, 8], strides = [1, 1, 1]} : vector<8x2x8xf32> to vector<1x2x8xf32>
    %44 = vector.shape_cast %43 : vector<1x2x8xf32> to vector<2x8xf32>
    %45 = vector.extract_strided_slice %42 {offsets = [0, 0], sizes = [2, 1], strides = [1, 1]} : vector<2x2xf32> to vector<2x1xf32>
    %46 = vector.broadcast %45 : vector<2x1xf32> to vector<2x8xf32>
    %47 = vector.broadcast %2 : vector<1x8xf32> to vector<2x8xf32>
    %48 = arith.mulf %46, %47 : vector<2x8xf32>
    %49 = arith.addf %44, %48 : vector<2x8xf32>
    %50 = vector.extract_strided_slice %42 {offsets = [0, 1], sizes = [2, 1], strides = [1, 1]} : vector<2x2xf32> to vector<2x1xf32>
    %51 = vector.broadcast %50 : vector<2x1xf32> to vector<2x8xf32>
    %52 = vector.broadcast %3 : vector<1x8xf32> to vector<2x8xf32>
    %53 = arith.mulf %51, %52 : vector<2x8xf32>
    %54 = arith.addf %49, %53 : vector<2x8xf32>
    %55 = arith.negf %54 : vector<2x8xf32>
    %56 = math.exp %55 : vector<2x8xf32>
    %cst_6 = arith.constant 1.000000e+00 : f32
    %57 = vector.broadcast %cst_6 : f32 to vector<2x8xf32>
    %58 = arith.addf %57, %56 : vector<2x8xf32>
    %59 = arith.divf %57, %58 : vector<2x8xf32>
    %60 = math.tanh %54 : vector<2x8xf32>
    %61 = arith.select %12, %60, %59 : vector<2x8xi1>, vector<2x8xf32>
    %62 = vector.extract_strided_slice %61 {offsets = [0, 0], sizes = [2, 2], strides = [1, 1]} : vector<2x8xf32> to vector<2x2xf32>
    %63 = vector.extract_strided_slice %61 {offsets = [0, 2], sizes = [2, 2], strides = [1, 1]} : vector<2x8xf32> to vector<2x2xf32>
    %64 = vector.extract_strided_slice %61 {offsets = [0, 4], sizes = [2, 2], strides = [1, 1]} : vector<2x8xf32> to vector<2x2xf32>
    %65 = vector.extract_strided_slice %61 {offsets = [0, 6], sizes = [2, 2], strides = [1, 1]} : vector<2x8xf32> to vector<2x2xf32>
    %66 = arith.mulf %63, %40 : vector<2x2xf32>
    %67 = arith.mulf %62, %64 : vector<2x2xf32>
    %68 = arith.addf %66, %67 : vector<2x2xf32>
    %69 = math.tanh %68 : vector<2x2xf32>
    %70 = arith.mulf %65, %69 : vector<2x2xf32>
    %71 = vector.extract_strided_slice %0 {offsets = [2, 0, 0], sizes = [1, 2, 8], strides = [1, 1, 1]} : vector<8x2x8xf32> to vector<1x2x8xf32>
    %72 = vector.shape_cast %71 : vector<1x2x8xf32> to vector<2x8xf32>
    %73 = vector.extract_strided_slice %70 {offsets = [0, 0], sizes = [2, 1], strides = [1, 1]} : vector<2x2xf32> to vector<2x1xf32>
    %74 = vector.broadcast %73 : vector<2x1xf32> to vector<2x8xf32>
    %75 = vector.broadcast %2 : vector<1x8xf32> to vector<2x8xf32>
    %76 = arith.mulf %74, %75 : vector<2x8xf32>
    %77 = arith.addf %72, %76 : vector<2x8xf32>
    %78 = vector.extract_strided_slice %70 {offsets = [0, 1], sizes = [2, 1], strides = [1, 1]} : vector<2x2xf32> to vector<2x1xf32>
    %79 = vector.broadcast %78 : vector<2x1xf32> to vector<2x8xf32>
    %80 = vector.broadcast %3 : vector<1x8xf32> to vector<2x8xf32>
    %81 = arith.mulf %79, %80 : vector<2x8xf32>
    %82 = arith.addf %77, %81 : vector<2x8xf32>
    %83 = arith.negf %82 : vector<2x8xf32>
    %84 = math.exp %83 : vector<2x8xf32>
    %cst_7 = arith.constant 1.000000e+00 : f32
    %85 = vector.broadcast %cst_7 : f32 to vector<2x8xf32>
    %86 = arith.addf %85, %84 : vector<2x8xf32>
    %87 = arith.divf %85, %86 : vector<2x8xf32>
    %88 = math.tanh %82 : vector<2x8xf32>
    %89 = arith.select %12, %88, %87 : vector<2x8xi1>, vector<2x8xf32>
    %90 = vector.extract_strided_slice %89 {offsets = [0, 0], sizes = [2, 2], strides = [1, 1]} : vector<2x8xf32> to vector<2x2xf32>
    %91 = vector.extract_strided_slice %89 {offsets = [0, 2], sizes = [2, 2], strides = [1, 1]} : vector<2x8xf32> to vector<2x2xf32>
    %92 = vector.extract_strided_slice %89 {offsets = [0, 4], sizes = [2, 2], strides = [1, 1]} : vector<2x8xf32> to vector<2x2xf32>
    %93 = vector.extract_strided_slice %89 {offsets = [0, 6], sizes = [2, 2], strides = [1, 1]} : vector<2x8xf32> to vector<2x2xf32>
    %94 = arith.mulf %91, %68 : vector<2x2xf32>
    %95 = arith.mulf %90, %92 : vector<2x2xf32>
    %96 = arith.addf %94, %95 : vector<2x2xf32>
    %97 = math.tanh %96 : vector<2x2xf32>
    %98 = arith.mulf %93, %97 : vector<2x2xf32>
    %99 = vector.extract_strided_slice %0 {offsets = [3, 0, 0], sizes = [1, 2, 8], strides = [1, 1, 1]} : vector<8x2x8xf32> to vector<1x2x8xf32>
    %100 = vector.shape_cast %99 : vector<1x2x8xf32> to vector<2x8xf32>
    %101 = vector.extract_strided_slice %98 {offsets = [0, 0], sizes = [2, 1], strides = [1, 1]} : vector<2x2xf32> to vector<2x1xf32>
    %102 = vector.broadcast %101 : vector<2x1xf32> to vector<2x8xf32>
    %103 = vector.broadcast %2 : vector<1x8xf32> to vector<2x8xf32>
    %104 = arith.mulf %102, %103 : vector<2x8xf32>
    %105 = arith.addf %100, %104 : vector<2x8xf32>
    %106 = vector.extract_strided_slice %98 {offsets = [0, 1], sizes = [2, 1], strides = [1, 1]} : vector<2x2xf32> to vector<2x1xf32>
    %107 = vector.broadcast %106 : vector<2x1xf32> to vector<2x8xf32>
    %108 = vector.broadcast %3 : vector<1x8xf32> to vector<2x8xf32>
    %109 = arith.mulf %107, %108 : vector<2x8xf32>
    %110 = arith.addf %105, %109 : vector<2x8xf32>
    %111 = arith.negf %110 : vector<2x8xf32>
    %112 = math.exp %111 : vector<2x8xf32>
    %cst_8 = arith.constant 1.000000e+00 : f32
    %113 = vector.broadcast %cst_8 : f32 to vector<2x8xf32>
    %114 = arith.addf %113, %112 : vector<2x8xf32>
    %115 = arith.divf %113, %114 : vector<2x8xf32>
    %116 = math.tanh %110 : vector<2x8xf32>
    %117 = arith.select %12, %116, %115 : vector<2x8xi1>, vector<2x8xf32>
    %118 = vector.extract_strided_slice %117 {offsets = [0, 0], sizes = [2, 2], strides = [1, 1]} : vector<2x8xf32> to vector<2x2xf32>
    %119 = vector.extract_strided_slice %117 {offsets = [0, 2], sizes = [2, 2], strides = [1, 1]} : vector<2x8xf32> to vector<2x2xf32>
    %120 = vector.extract_strided_slice %117 {offsets = [0, 4], sizes = [2, 2], strides = [1, 1]} : vector<2x8xf32> to vector<2x2xf32>
    %121 = vector.extract_strided_slice %117 {offsets = [0, 6], sizes = [2, 2], strides = [1, 1]} : vector<2x8xf32> to vector<2x2xf32>
    %122 = arith.mulf %119, %96 : vector<2x2xf32>
    %123 = arith.mulf %118, %120 : vector<2x2xf32>
    %124 = arith.addf %122, %123 : vector<2x2xf32>
    %125 = math.tanh %124 : vector<2x2xf32>
    %126 = arith.mulf %121, %125 : vector<2x2xf32>
    %127 = vector.extract_strided_slice %0 {offsets = [4, 0, 0], sizes = [1, 2, 8], strides = [1, 1, 1]} : vector<8x2x8xf32> to vector<1x2x8xf32>
    %128 = vector.shape_cast %127 : vector<1x2x8xf32> to vector<2x8xf32>
    %129 = vector.extract_strided_slice %126 {offsets = [0, 0], sizes = [2, 1], strides = [1, 1]} : vector<2x2xf32> to vector<2x1xf32>
    %130 = vector.broadcast %129 : vector<2x1xf32> to vector<2x8xf32>
    %131 = vector.broadcast %2 : vector<1x8xf32> to vector<2x8xf32>
    %132 = arith.mulf %130, %131 : vector<2x8xf32>
    %133 = arith.addf %128, %132 : vector<2x8xf32>
    %134 = vector.extract_strided_slice %126 {offsets = [0, 1], sizes = [2, 1], strides = [1, 1]} : vector<2x2xf32> to vector<2x1xf32>
    %135 = vector.broadcast %134 : vector<2x1xf32> to vector<2x8xf32>
    %136 = vector.broadcast %3 : vector<1x8xf32> to vector<2x8xf32>
    %137 = arith.mulf %135, %136 : vector<2x8xf32>
    %138 = arith.addf %133, %137 : vector<2x8xf32>
    %139 = arith.negf %138 : vector<2x8xf32>
    %140 = math.exp %139 : vector<2x8xf32>
    %cst_9 = arith.constant 1.000000e+00 : f32
    %141 = vector.broadcast %cst_9 : f32 to vector<2x8xf32>
    %142 = arith.addf %141, %140 : vector<2x8xf32>
    %143 = arith.divf %141, %142 : vector<2x8xf32>
    %144 = math.tanh %138 : vector<2x8xf32>
    %145 = arith.select %12, %144, %143 : vector<2x8xi1>, vector<2x8xf32>
    %146 = vector.extract_strided_slice %145 {offsets = [0, 0], sizes = [2, 2], strides = [1, 1]} : vector<2x8xf32> to vector<2x2xf32>
    %147 = vector.extract_strided_slice %145 {offsets = [0, 2], sizes = [2, 2], strides = [1, 1]} : vector<2x8xf32> to vector<2x2xf32>
    %148 = vector.extract_strided_slice %145 {offsets = [0, 4], sizes = [2, 2], strides = [1, 1]} : vector<2x8xf32> to vector<2x2xf32>
    %149 = vector.extract_strided_slice %145 {offsets = [0, 6], sizes = [2, 2], strides = [1, 1]} : vector<2x8xf32> to vector<2x2xf32>
    %150 = arith.mulf %147, %124 : vector<2x2xf32>
    %151 = arith.mulf %146, %148 : vector<2x2xf32>
    %152 = arith.addf %150, %151 : vector<2x2xf32>
    %153 = math.tanh %152 : vector<2x2xf32>
    %154 = arith.mulf %149, %153 : vector<2x2xf32>
    %155 = vector.extract_strided_slice %0 {offsets = [5, 0, 0], sizes = [1, 2, 8], strides = [1, 1, 1]} : vector<8x2x8xf32> to vector<1x2x8xf32>
    %156 = vector.shape_cast %155 : vector<1x2x8xf32> to vector<2x8xf32>
    %157 = vector.extract_strided_slice %154 {offsets = [0, 0], sizes = [2, 1], strides = [1, 1]} : vector<2x2xf32> to vector<2x1xf32>
    %158 = vector.broadcast %157 : vector<2x1xf32> to vector<2x8xf32>
    %159 = vector.broadcast %2 : vector<1x8xf32> to vector<2x8xf32>
    %160 = arith.mulf %158, %159 : vector<2x8xf32>
    %161 = arith.addf %156, %160 : vector<2x8xf32>
    %162 = vector.extract_strided_slice %154 {offsets = [0, 1], sizes = [2, 1], strides = [1, 1]} : vector<2x2xf32> to vector<2x1xf32>
    %163 = vector.broadcast %162 : vector<2x1xf32> to vector<2x8xf32>
    %164 = vector.broadcast %3 : vector<1x8xf32> to vector<2x8xf32>
    %165 = arith.mulf %163, %164 : vector<2x8xf32>
    %166 = arith.addf %161, %165 : vector<2x8xf32>
    %167 = arith.negf %166 : vector<2x8xf32>
    %168 = math.exp %167 : vector<2x8xf32>
    %cst_10 = arith.constant 1.000000e+00 : f32
    %169 = vector.broadcast %cst_10 : f32 to vector<2x8xf32>
    %170 = arith.addf %169, %168 : vector<2x8xf32>
    %171 = arith.divf %169, %170 : vector<2x8xf32>
    %172 = math.tanh %166 : vector<2x8xf32>
    %173 = arith.select %12, %172, %171 : vector<2x8xi1>, vector<2x8xf32>
    %174 = vector.extract_strided_slice %173 {offsets = [0, 0], sizes = [2, 2], strides = [1, 1]} : vector<2x8xf32> to vector<2x2xf32>
    %175 = vector.extract_strided_slice %173 {offsets = [0, 2], sizes = [2, 2], strides = [1, 1]} : vector<2x8xf32> to vector<2x2xf32>
    %176 = vector.extract_strided_slice %173 {offsets = [0, 4], sizes = [2, 2], strides = [1, 1]} : vector<2x8xf32> to vector<2x2xf32>
    %177 = vector.extract_strided_slice %173 {offsets = [0, 6], sizes = [2, 2], strides = [1, 1]} : vector<2x8xf32> to vector<2x2xf32>
    %178 = arith.mulf %175, %152 : vector<2x2xf32>
    %179 = arith.mulf %174, %176 : vector<2x2xf32>
    %180 = arith.addf %178, %179 : vector<2x2xf32>
    %181 = math.tanh %180 : vector<2x2xf32>
    %182 = arith.mulf %177, %181 : vector<2x2xf32>
    %183 = vector.extract_strided_slice %0 {offsets = [6, 0, 0], sizes = [1, 2, 8], strides = [1, 1, 1]} : vector<8x2x8xf32> to vector<1x2x8xf32>
    %184 = vector.shape_cast %183 : vector<1x2x8xf32> to vector<2x8xf32>
    %185 = vector.extract_strided_slice %182 {offsets = [0, 0], sizes = [2, 1], strides = [1, 1]} : vector<2x2xf32> to vector<2x1xf32>
    %186 = vector.broadcast %185 : vector<2x1xf32> to vector<2x8xf32>
    %187 = vector.broadcast %2 : vector<1x8xf32> to vector<2x8xf32>
    %188 = arith.mulf %186, %187 : vector<2x8xf32>
    %189 = arith.addf %184, %188 : vector<2x8xf32>
    %190 = vector.extract_strided_slice %182 {offsets = [0, 1], sizes = [2, 1], strides = [1, 1]} : vector<2x2xf32> to vector<2x1xf32>
    %191 = vector.broadcast %190 : vector<2x1xf32> to vector<2x8xf32>
    %192 = vector.broadcast %3 : vector<1x8xf32> to vector<2x8xf32>
    %193 = arith.mulf %191, %192 : vector<2x8xf32>
    %194 = arith.addf %189, %193 : vector<2x8xf32>
    %195 = arith.negf %194 : vector<2x8xf32>
    %196 = math.exp %195 : vector<2x8xf32>
    %cst_11 = arith.constant 1.000000e+00 : f32
    %197 = vector.broadcast %cst_11 : f32 to vector<2x8xf32>
    %198 = arith.addf %197, %196 : vector<2x8xf32>
    %199 = arith.divf %197, %198 : vector<2x8xf32>
    %200 = math.tanh %194 : vector<2x8xf32>
    %201 = arith.select %12, %200, %199 : vector<2x8xi1>, vector<2x8xf32>
    %202 = vector.extract_strided_slice %201 {offsets = [0, 0], sizes = [2, 2], strides = [1, 1]} : vector<2x8xf32> to vector<2x2xf32>
    %203 = vector.extract_strided_slice %201 {offsets = [0, 2], sizes = [2, 2], strides = [1, 1]} : vector<2x8xf32> to vector<2x2xf32>
    %204 = vector.extract_strided_slice %201 {offsets = [0, 4], sizes = [2, 2], strides = [1, 1]} : vector<2x8xf32> to vector<2x2xf32>
    %205 = vector.extract_strided_slice %201 {offsets = [0, 6], sizes = [2, 2], strides = [1, 1]} : vector<2x8xf32> to vector<2x2xf32>
    %206 = arith.mulf %203, %180 : vector<2x2xf32>
    %207 = arith.mulf %202, %204 : vector<2x2xf32>
    %208 = arith.addf %206, %207 : vector<2x2xf32>
    %209 = math.tanh %208 : vector<2x2xf32>
    %210 = arith.mulf %205, %209 : vector<2x2xf32>
    %211 = vector.extract_strided_slice %0 {offsets = [7, 0, 0], sizes = [1, 2, 8], strides = [1, 1, 1]} : vector<8x2x8xf32> to vector<1x2x8xf32>
    %212 = vector.shape_cast %211 : vector<1x2x8xf32> to vector<2x8xf32>
    %213 = vector.extract_strided_slice %210 {offsets = [0, 0], sizes = [2, 1], strides = [1, 1]} : vector<2x2xf32> to vector<2x1xf32>
    %214 = vector.broadcast %213 : vector<2x1xf32> to vector<2x8xf32>
    %215 = vector.broadcast %2 : vector<1x8xf32> to vector<2x8xf32>
    %216 = arith.mulf %214, %215 : vector<2x8xf32>
    %217 = arith.addf %212, %216 : vector<2x8xf32>
    %218 = vector.extract_strided_slice %210 {offsets = [0, 1], sizes = [2, 1], strides = [1, 1]} : vector<2x2xf32> to vector<2x1xf32>
    %219 = vector.broadcast %218 : vector<2x1xf32> to vector<2x8xf32>
    %220 = vector.broadcast %3 : vector<1x8xf32> to vector<2x8xf32>
    %221 = arith.mulf %219, %220 : vector<2x8xf32>
    %222 = arith.addf %217, %221 : vector<2x8xf32>
    %223 = arith.negf %222 : vector<2x8xf32>
    %224 = math.exp %223 : vector<2x8xf32>
    %cst_12 = arith.constant 1.000000e+00 : f32
    %225 = vector.broadcast %cst_12 : f32 to vector<2x8xf32>
    %226 = arith.addf %225, %224 : vector<2x8xf32>
    %227 = arith.divf %225, %226 : vector<2x8xf32>
    %228 = math.tanh %222 : vector<2x8xf32>
    %229 = arith.select %12, %228, %227 : vector<2x8xi1>, vector<2x8xf32>
    %230 = vector.extract_strided_slice %229 {offsets = [0, 0], sizes = [2, 2], strides = [1, 1]} : vector<2x8xf32> to vector<2x2xf32>
    %231 = vector.extract_strided_slice %229 {offsets = [0, 2], sizes = [2, 2], strides = [1, 1]} : vector<2x8xf32> to vector<2x2xf32>
    %232 = vector.extract_strided_slice %229 {offsets = [0, 4], sizes = [2, 2], strides = [1, 1]} : vector<2x8xf32> to vector<2x2xf32>
    %233 = vector.extract_strided_slice %229 {offsets = [0, 6], sizes = [2, 2], strides = [1, 1]} : vector<2x8xf32> to vector<2x2xf32>
    %234 = arith.mulf %231, %208 : vector<2x2xf32>
    %235 = arith.mulf %230, %232 : vector<2x2xf32>
    %236 = arith.addf %234, %235 : vector<2x2xf32>
    %237 = math.tanh %236 : vector<2x2xf32>
    %238 = arith.mulf %233, %237 : vector<2x2xf32>
    %239 = vector.shape_cast %6 : vector<1x7xf32> to vector<1x7xf32>
    %240 = vector.broadcast %239 : vector<1x7xf32> to vector<2x7xf32>
    %241 = vector.extract_strided_slice %238 {offsets = [0, 0], sizes = [2, 1], strides = [1, 1]} : vector<2x2xf32> to vector<2x1xf32>
    %242 = vector.broadcast %241 : vector<2x1xf32> to vector<2x7xf32>
    %243 = vector.broadcast %4 : vector<1x7xf32> to vector<2x7xf32>
    %244 = arith.mulf %242, %243 : vector<2x7xf32>
    %245 = arith.addf %240, %244 : vector<2x7xf32>
    %246 = vector.extract_strided_slice %238 {offsets = [0, 1], sizes = [2, 1], strides = [1, 1]} : vector<2x2xf32> to vector<2x1xf32>
    %247 = vector.broadcast %246 : vector<2x1xf32> to vector<2x7xf32>
    %248 = vector.broadcast %5 : vector<1x7xf32> to vector<2x7xf32>
    %249 = arith.mulf %247, %248 : vector<2x7xf32>
    %250 = arith.addf %245, %249 : vector<2x7xf32>
    %c0_13 = arith.constant 0 : index
    %c0_14 = arith.constant 0 : index
    %251 = vector.load %arg2[%c0_13, %c0_14] : memref<2x7xf32, #tpu.memory_space<vmem>>, vector<2x7xf32>
    tpu.vector_store %arg2[%c0_13, %c0_14], %250 {strides = array<i32>} : memref<2x7xf32, #tpu.memory_space<vmem>>, vector<2x7xf32>,
    return
  }
}

</mosaic_0001>

<bundles_post_ra>
// kernel: lstm_lm_forward.1
= control target key start
LH: loop header
LB: loop body
LE: loop exit
PB: predicated region body
PF: predicated region fallthrough
CT: control target
= control target key end

     0   :  { %v21_v0 = vlaneseq  ;;  %s617_s0 = inlined_call_operand.vmem [shape: f32[8,2,8], index: 0, kind: input, shape index: {}]   ;;  %s618_s1 = inlined_call_operand.vmem [shape: f32[5,8], index: 1, kind: input, shape index: {}]   ;;  %s619_s2 = inlined_call_operand.hbm [shape: f32[2,7], index: 2, kind: output, shape index: {}]  }
   0x1   :  { %7 = vsyncpa [#allocation3], 0  ;;  %v505_v2 = vld [vmem:[%s618_s1] sm:$0x1f]  ;;  %s479_s1 = smov 124   ;;  %s480_s13 = smov 2  }
   0x2   :  { %v500_v1 = vshrl.u32 %v21_v0, 7  ;;  %v12_v7 = vld [vmem:[%s617_s0] sm:$0x3]  ;;  %v22_v15 = vand.u32 127, %v21_v0  ;;  %v481_v25 = vmov 7   ;;  %v482_v26 = vmov 6  }
   0x3   :  { %385 = vset.pattern.permute.xlu0 %v481_v25  ;;  %384 = vset.pattern.permute.xlu1 %v482_v26  ;;  %s483_s14 = smov 4   ;;  %v13_v31 = vld [vmem:[%s617_s0 + $0x2] sm:$0x3]  ;;  %v14_v52 = vld [vmem:[%s617_s0 + $0x4] sm:$0x3]  ;;  %vm354_vm3 = vcmask 50176  }
   0x4   :  { %v28_v3 = vsub.s32 0, %v500_v1  ;;  %v34_v4 = vsub.s32 1, %v500_v1  ;;  %vm23_vm0 = vcmp.ge.s32.totalorder %v22_v15, 4  ;;  %vm24_vm1 = vcmp.lt.s32.totalorder %v22_v15, 6 }
   0x5   :  { %vm520_vm2 = vmand %vm23_vm0, %vm24_vm1  ;;  %v340_v17 = vsub.s32 2, %v500_v1 }
   0x6   :  { %v510_v5 = vrot.slane %v505_v2, %v28_v3  ;;  %v513_v6 = vrot.slane %v505_v2, %v34_v4 }
   0x8   :  { %v30_v8 = vmul.f32 0.0, %v510_v5  ;;  %v36_v9 = vmul.f32 0.0, %v513_v6 }
   0xa   :  { %v31_v10 = vadd.f32 %v30_v8, %v12_v7 }
   0xc   :  { %v37_v11 = vadd.f32 %v36_v9, %v31_v10 }
   0xe   :  { %v370_v12 = vmul.f32 -1.442695, %v37_v11 }
  0x10   :  { %393 = vpow2.f32 %v370_v12 }
  0x11   :  { %395 = vtanh.f32 %v37_v11 }
  0x1d   :  { %v394_v13 = vpop.eup %393 }
  0x1e   :  { %v41_v14 = vadd.f32 1.0, %v394_v13  ;;  %v396_v16 = vpop.eup %395  ;;  %v15_v13 = vld [vmem:[%s617_s0 + $0x6] sm:$0x3] }
  0x20   :  { %397 = vrcp.f32 %v41_v14 }
  0x2d   :  { %v398_v18 = vpop.eup %397 }
  0x2e   :  { %v45_v19 = vsel %vm520_vm2, %v396_v16, %v398_v18 }
  0x2f   :  { %48 = vrot.lane.b32.xlu0 %v45_v19, %s479_s1  ;;  %v46_v22 = vmul.f32 0.0, %v45_v19 }
  0xa1   :  { %v49_v20 = vpop.permute.xlu0 %48 }
  0xa2   :  { %v51_v21 = vmul.f32 %v49_v20, %v45_v19 }
  0xa4   :  { %53 = vrot.lane.b32.xlu0 %v51_v21, %s480_s13 }
 0x116   :  { %v54_v23 = vpop.permute.xlu0 %53 }
 0x117   :  { %v56_v24 = vadd.f32 %v54_v23, %v46_v22 }
 0x119   :  { %399 = vtanh.f32 %v56_v24 }
 0x126   :  { %v400_v27 = vpop.eup %399 }
 0x127   :  { %59 = vrot.lane.b32.xlu1 %v400_v27, %s483_s14 }
 0x199   :  { %v60_v28 = vpop.permute.xlu1 %59 }
 0x19a   :  { %v62_v29 = vmul.f32 %v60_v28, %v45_v19 }
 0x19c   :  { %71 = vperm.xlu0 %385, %v62_v29   ;;  %65 = vperm.xlu1 %384, %v62_v29  }
 0x217   :  { %v72_v30 = vpop.permute.xlu0 %71  ;;  %v66_v32 = vpop.permute.xlu1 %65 }
 0x218   :  { %v68_v33 = vmul.f32 %v66_v32, %v510_v5  ;;  %v74_v34 = vmul.f32 %v72_v30, %v513_v6 }
 0x21a   :  { %v69_v35 = vadd.f32 %v68_v33, %v13_v31 }
 0x21c   :  { %v75_v36 = vadd.f32 %v74_v34, %v69_v35 }
 0x21e   :  { %v371_v37 = vmul.f32 -1.442695, %v75_v36 }
 0x220   :  { %401 = vpow2.f32 %v371_v37  ;;  %v16_v37 = vld [vmem:[%s617_s0 + $0x8] sm:$0x3] }
 0x221   :  { %403 = vtanh.f32 %v75_v36 }
 0x22d   :  { %v402_v38 = vpop.eup %401 }
 0x22e   :  { %v79_v39 = vadd.f32 1.0, %v402_v38  ;;  %v404_v40 = vpop.eup %403 }
 0x230   :  { %405 = vrcp.f32 %v79_v39 }
 0x23d   :  { %v406_v41 = vpop.eup %405 }
 0x23e   :  { %v83_v42 = vsel %vm520_vm2, %v404_v40, %v406_v41 }
 0x23f   :  { %86 = vrot.lane.b32.xlu1 %v83_v42, %s479_s1  ;;  %v84_v45 = vmul.f32 %v83_v42, %v56_v24 }
 0x2b1   :  { %v87_v43 = vpop.permute.xlu1 %86 }
 0x2b2   :  { %v89_v44 = vmul.f32 %v87_v43, %v83_v42 }
 0x2b4   :  { %91 = vrot.lane.b32.xlu1 %v89_v44, %s480_s13 }
 0x326   :  { %v92_v46 = vpop.permute.xlu1 %91 }
 0x327   :  { %v94_v47 = vadd.f32 %v92_v46, %v84_v45 }
 0x329   :  { %407 = vtanh.f32 %v94_v47 }
 0x336   :  { %v408_v48 = vpop.eup %407 }
 0x337   :  { %97 = vrot.lane.b32.xlu0 %v408_v48, %s483_s14 }
 0x3a9   :  { %v98_v49 = vpop.permute.xlu0 %97 }
 0x3aa   :  { %v100_v50 = vmul.f32 %v98_v49, %v83_v42 }
 0x3ac   :  { %109 = vperm.xlu0 %385, %v100_v50   ;;  %103 = vperm.xlu1 %384, %v100_v50  }
 0x3b0   :  { %386 = vset.pattern.permute.xlu0 %v482_v26  ;;  %387 = vset.pattern.permute.xlu1 %v481_v25 }
 0x427   :  { %v110_v51 = vpop.permute.xlu0 %109  ;;  %v104_v53 = vpop.permute.xlu1 %103 }
 0x428   :  { %v106_v54 = vmul.f32 %v104_v53, %v510_v5  ;;  %v112_v55 = vmul.f32 %v110_v51, %v513_v6 }
 0x42a   :  { %v107_v56 = vadd.f32 %v106_v54, %v14_v52 }
 0x42c   :  { %v113_v57 = vadd.f32 %v112_v55, %v107_v56 }
 0x42e   :  { %v372_v58 = vmul.f32 -1.442695, %v113_v57 }
 0x430   :  { %409 = vpow2.f32 %v372_v58  ;;  %v17_v58 = vld [vmem:[%s617_s0 + $0xa] sm:$0x3] }
 0x431   :  { %411 = vtanh.f32 %v113_v57 }
 0x43d   :  { %v410_v59 = vpop.eup %409 }
 0x43e   :  { %v117_v60 = vadd.f32 1.0, %v410_v59  ;;  %v412_v61 = vpop.eup %411 }
 0x440   :  { %413 = vrcp.f32 %v117_v60 }
 0x44d   :  { %v414_v62 = vpop.eup %413 }
 0x44e   :  { %v121_v63 = vsel %vm520_vm2, %v412_v61, %v414_v62 }
 0x44f   :  { %124 = vrot.lane.b32.xlu1 %v121_v63, %s479_s1  ;;  %v122_v4 = vmul.f32 %v121_v63, %v94_v47 }
 0x4c1   :  { %v125_v0 = vpop.permute.xlu1 %124 }
 0x4c2   :  { %v127_v3 = vmul.f32 %v125_v0, %v121_v63 }
 0x4c4   :  { %129 = vrot.lane.b32.xlu0 %v127_v3, %s480_s13 }
 0x536   :  { %v130_v7 = vpop.permute.xlu0 %129 }
 0x537   :  { %v132_v8 = vadd.f32 %v130_v7, %v122_v4 }
 0x539   :  { %415 = vtanh.f32 %v132_v8 }
 0x546   :  { %v416_v9 = vpop.eup %415 }
 0x547   :  { %135 = vrot.lane.b32.xlu1 %v416_v9, %s483_s14 }
 0x5b9   :  { %v136_v10 = vpop.permute.xlu1 %135 }
 0x5ba   :  { %v138_v11 = vmul.f32 %v136_v10, %v121_v63 }
 0x5bc   :  { %147 = vperm.xlu1 %387, %v138_v11   ;;  %141 = vperm.xlu0 %386, %v138_v11  }
 0x637   :  { %v148_v12 = vpop.permute.xlu1 %147  ;;  %v142_v14 = vpop.permute.xlu0 %141 }
 0x638   :  { %v144_v15 = vmul.f32 %v142_v14, %v510_v5  ;;  %v150_v16 = vmul.f32 %v148_v12, %v513_v6 }
 0x63a   :  { %v145_v18 = vadd.f32 %v144_v15, %v15_v13 }
 0x63c   :  { %v151_v19 = vadd.f32 %v150_v16, %v145_v18 }
 0x63e   :  { %v373_v20 = vmul.f32 -1.442695, %v151_v19 }
 0x640   :  { %417 = vpow2.f32 %v373_v20  ;;  %v18_v20 = vld [vmem:[%s617_s0 + $0xc] sm:$0x3] }
 0x641   :  { %419 = vtanh.f32 %v151_v19 }
 0x64d   :  { %v418_v21 = vpop.eup %417 }
 0x64e   :  { %v155_v22 = vadd.f32 1.0, %v418_v21  ;;  %v420_v23 = vpop.eup %419 }
 0x650   :  { %421 = vrcp.f32 %v155_v22 }
 0x65d   :  { %v422_v24 = vpop.eup %421 }
 0x65e   :  { %v159_v27 = vsel %vm520_vm2, %v420_v23, %v422_v24 }
 0x65f   :  { %162 = vrot.lane.b32.xlu1 %v159_v27, %s479_s1  ;;  %v160_v30 = vmul.f32 %v159_v27, %v132_v8 }
 0x6d1   :  { %v163_v28 = vpop.permute.xlu1 %162 }
 0x6d2   :  { %v165_v29 = vmul.f32 %v163_v28, %v159_v27 }
 0x6d4   :  { %167 = vrot.lane.b32.xlu0 %v165_v29, %s480_s13 }
 0x746   :  { %v168_v31 = vpop.permute.xlu0 %167 }
 0x747   :  { %v170_v32 = vadd.f32 %v168_v31, %v160_v30 }
 0x749   :  { %423 = vtanh.f32 %v170_v32 }
 0x756   :  { %v424_v33 = vpop.eup %423 }
 0x757   :  { %173 = vrot.lane.b32.xlu1 %v424_v33, %s483_s14 }
 0x7c9   :  { %v174_v34 = vpop.permute.xlu1 %173 }
 0x7ca   :  { %v176_v35 = vmul.f32 %v174_v34, %v159_v27 }
 0x7cc   :  { %185 = vperm.xlu1 %387, %v176_v35   ;;  %179 = vperm.xlu0 %386, %v176_v35  }
 0x7d0   :  { %388 = vset.pattern.permute.xlu1 %v482_v26  ;;  %389 = vset.pattern.permute.xlu0 %v481_v25 }
 0x847   :  { %v186_v36 = vpop.permute.xlu1 %185  ;;  %v180_v38 = vpop.permute.xlu0 %179 }
 0x848   :  { %v182_v39 = vmul.f32 %v180_v38, %v510_v5  ;;  %v188_v40 = vmul.f32 %v186_v36, %v513_v6 }
 0x84a   :  { %v183_v41 = vadd.f32 %v182_v39, %v16_v37 }
 0x84c   :  { %v189_v42 = vadd.f32 %v188_v40, %v183_v41 }
 0x84e   :  { %v374_v43 = vmul.f32 -1.442695, %v189_v42 }
 0x850   :  { %425 = vpow2.f32 %v374_v43 }
 0x851   :  { %427 = vtanh.f32 %v189_v42  ;;  %v19_v42 = vld [vmem:[%s617_s0 + $0xe] sm:$0x3]  ;;  %s484_s0 = smov [#allocation2]  }
 0x852   :  { %s362_s29 = sshll.u32 %s484_s0, 4  ;;  %s363_s29 = int_to_ptr.vmem [resolvable:$true] %s362_s29 }
 0x853   :  { %s457_s30 = scalar_lea.vmem %s363_s29, 32  ;;  %p462_p1 = scmp.lt.s32.totalorder %s363_s29, %s363_s29 }
 0x854   :  { %p458_p0 = scmp.ne.s32.totalorder %s363_s29, %s457_s30  ;;  %p463_p2 = scmp.lt.s32.totalorder %s457_s30, %s457_s30 }
 0x856   :  { %p464_p3 = por %p463_p2, %p462_p1 }
 0x858   :  { %p465_p4 = pnand %p464_p3, %p458_p0 }
 0x85d   :  { %v426_v44 = vpop.eup %425 }
 0x85e   :  { %v193_v45 = vadd.f32 1.0, %v426_v44  ;;  %v428_v46 = vpop.eup %427 }
 0x860   :  { %429 = vrcp.f32 %v193_v45 }
 0x86d   :  { %v430_v47 = vpop.eup %429 }
 0x86e   :  { %v197_v48 = vsel %vm520_vm2, %v428_v46, %v430_v47 }
 0x86f   :  { %200 = vrot.lane.b32.xlu0 %v197_v48, %s479_s1  ;;  %v198_v51 = vmul.f32 %v197_v48, %v170_v32 }
 0x8e1   :  { %v201_v49 = vpop.permute.xlu0 %200 }
 0x8e2   :  { %v203_v50 = vmul.f32 %v201_v49, %v197_v48 }
 0x8e4   :  { %205 = vrot.lane.b32.xlu1 %v203_v50, %s480_s13 }
 0x956   :  { %v206_v52 = vpop.permute.xlu1 %205 }
 0x957   :  { %v208_v53 = vadd.f32 %v206_v52, %v198_v51 }
 0x959   :  { %431 = vtanh.f32 %v208_v53 }
 0x966   :  { %v432_v54 = vpop.eup %431 }
 0x967   :  { %211 = vrot.lane.b32.xlu0 %v432_v54, %s483_s14 }
 0x9d9   :  { %v212_v55 = vpop.permute.xlu0 %211 }
 0x9da   :  { %v214_v56 = vmul.f32 %v212_v55, %v197_v48 }
 0x9dc   :  { %223 = vperm.xlu0 %389, %v214_v56   ;;  %217 = vperm.xlu1 %388, %v214_v56  }
 0xa57   :  { %v224_v57 = vpop.permute.xlu0 %223  ;;  %v218_v59 = vpop.permute.xlu1 %217 }
 0xa58   :  { %v220_v60 = vmul.f32 %v218_v59, %v510_v5  ;;  %v226_v61 = vmul.f32 %v224_v57, %v513_v6 }
 0xa5a   :  { %v221_v62 = vadd.f32 %v220_v60, %v17_v58  ;;  %v350_v60 = vsub.s32 3, %v500_v1 }
 0xa5c   :  { %v227_v63 = vadd.f32 %v226_v61, %v221_v62  ;;  %v331_v61 = vsub.s32 4, %v500_v1  ;;  %v341_v62 = vrot.slane %v505_v2, %v340_v17 }
 0xa5e   :  { %v375_v0 = vmul.f32 -1.442695, %v227_v63 }
 0xa60   :  { %433 = vpow2.f32 %v375_v0  ;;  %v332_v0 = vrot.slane %v505_v2, %v331_v61 }
 0xa61   :  { %435 = vtanh.f32 %v227_v63  ;;  %v351_v63 = vrot.slane %v505_v2, %v350_v60 }
 0xa6d   :  { %v434_v3 = vpop.eup %433 }
 0xa6e   :  { %v231_v4 = vadd.f32 1.0, %v434_v3  ;;  %v436_v7 = vpop.eup %435 }
 0xa70   :  { %437 = vrcp.f32 %v231_v4 }
 0xa7d   :  { %v438_v8 = vpop.eup %437 }
 0xa7e   :  { %v235_v9 = vsel %vm520_vm2, %v436_v7, %v438_v8 }
 0xa7f   :  { %238 = vrot.lane.b32.xlu1 %v235_v9, %s479_s1  ;;  %v236_v12 = vmul.f32 %v235_v9, %v208_v53 }
 0xaf1   :  { %v239_v10 = vpop.permute.xlu1 %238 }
 0xaf2   :  { %v241_v11 = vmul.f32 %v239_v10, %v235_v9 }
 0xaf4   :  { %243 = vrot.lane.b32.xlu1 %v241_v11, %s480_s13 }
 0xb66   :  { %v244_v13 = vpop.permute.xlu1 %243 }
 0xb67   :  { %v246_v14 = vadd.f32 %v244_v13, %v236_v12 }
 0xb69   :  { %439 = vtanh.f32 %v246_v14 }
 0xb76   :  { %v440_v15 = vpop.eup %439 }
 0xb77   :  { %249 = vrot.lane.b32.xlu0 %v440_v15, %s483_s14 }
 0xbe9   :  { %v250_v16 = vpop.permute.xlu0 %249 }
 0xbea   :  { %v252_v18 = vmul.f32 %v250_v16, %v235_v9 }
 0xbec   :  { %261 = vperm.xlu0 %389, %v252_v18   ;;  %255 = vperm.xlu1 %388, %v252_v18  }
 0xbf0   :  { %390 = vset.pattern.permute.xlu0 %v482_v26  ;;  %391 = vset.pattern.permute.xlu1 %v481_v25 }
 0xc67   :  { %v262_v19 = vpop.permute.xlu0 %261  ;;  %v256_v21 = vpop.permute.xlu1 %255 }
 0xc68   :  { %v258_v22 = vmul.f32 %v256_v21, %v510_v5  ;;  %v264_v23 = vmul.f32 %v262_v19, %v513_v6 }
 0xc6a   :  { %v259_v24 = vadd.f32 %v258_v22, %v18_v20 }
 0xc6c   :  { %v265_v27 = vadd.f32 %v264_v23, %v259_v24 }
 0xc6e   :  { %v376_v28 = vmul.f32 -1.442695, %v265_v27 }
 0xc70   :  { %441 = vpow2.f32 %v376_v28 }
 0xc71   :  { %443 = vtanh.f32 %v265_v27 }
 0xc7d   :  { %v442_v29 = vpop.eup %441 }
 0xc7e   :  { %v269_v30 = vadd.f32 1.0, %v442_v29  ;;  %v444_v26 = vpop.eup %443 }
 0xc80   :  { %445 = vrcp.f32 %v269_v30 }
 0xc8d   :  { %v446_v31 = vpop.eup %445 }
 0xc8e   :  { %v273_v32 = vsel %vm520_vm2, %v444_v26, %v446_v31 }
 0xc8f   :  { %276 = vrot.lane.b32.xlu1 %v273_v32, %s479_s1  ;;  %v274_v35 = vmul.f32 %v273_v32, %v246_v14 }
 0xd01   :  { %v277_v33 = vpop.permute.xlu1 %276 }
 0xd02   :  { %v279_v34 = vmul.f32 %v277_v33, %v273_v32 }
 0xd04   :  { %281 = vrot.lane.b32.xlu0 %v279_v34, %s480_s13 }
 0xd76   :  { %v282_v36 = vpop.permute.xlu0 %281 }
 0xd77   :  { %v284_v37 = vadd.f32 %v282_v36, %v274_v35 }
 0xd79   :  { %447 = vtanh.f32 %v284_v37 }
 0xd86   :  { %v448_v38 = vpop.eup %447 }
 0xd87   :  { %287 = vrot.lane.b32.xlu1 %v448_v38, %s483_s14 }
 0xdf9   :  { %v288_v39 = vpop.permute.xlu1 %287 }
 0xdfa   :  { %v290_v40 = vmul.f32 %v288_v39, %v273_v32 }
 0xdfc   :  { %299 = vperm.xlu1 %391, %v290_v40   ;;  %293 = vperm.xlu0 %390, %v290_v40  }
 0xe77   :  { %v300_v41 = vpop.permute.xlu1 %299  ;;  %v294_v43 = vpop.permute.xlu0 %293 }
 0xe78   :  { %v296_v44 = vmul.f32 %v294_v43, %v510_v5  ;;  %v302_v45 = vmul.f32 %v300_v41, %v513_v6 }
 0xe7a   :  { %v297_v46 = vadd.f32 %v296_v44, %v19_v42 }
 0xe7c   :  { %v303_v47 = vadd.f32 %v302_v45, %v297_v46 }
 0xe7e   :  { %v377_v48 = vmul.f32 -1.442695, %v303_v47 }
 0xe80   :  { %449 = vpow2.f32 %v377_v48 }
 0xe81   :  { %451 = vtanh.f32 %v303_v47 }
 0xe8d   :  { %v450_v49 = vpop.eup %449 }
 0xe8e   :  { %v307_v50 = vadd.f32 1.0, %v450_v49  ;;  %v452_v51 = vpop.eup %451 }
 0xe90   :  { %453 = vrcp.f32 %v307_v50 }
 0xe9d   :  { %v454_v52 = vpop.eup %453 }
 0xe9e   :  { %v311_v53 = vsel %vm520_vm2, %v452_v51, %v454_v52 }
 0xe9f   :  { %314 = vrot.lane.b32.xlu1 %v311_v53, %s479_s1  ;;  %v312_v5 = vmul.f32 %v311_v53, %v284_v37 }
 0xf11   :  { %v315_v54 = vpop.permute.xlu1 %314 }
 0xf12   :  { %v317_v55 = vmul.f32 %v315_v54, %v311_v53 }
 0xf14   :  { %319 = vrot.lane.b32.xlu0 %v317_v55, %s480_s13 }
 0xf86   :  { %v320_v6 = vpop.permute.xlu0 %319 }
 0xf87   :  { %v322_v56 = vadd.f32 %v320_v6, %v312_v5 }
 0xf89   :  { %455 = vtanh.f32 %v322_v56 }
 0xf96   :  { %v456_v57 = vpop.eup %455 }
 0xf97   :  { %325 = vrot.lane.b32.xlu1 %v456_v57, %s483_s14 }
0x1009   :  { %v326_v58 = vpop.permute.xlu1 %325 }
0x100a   :  { %v328_v59 = vmul.f32 %v326_v58, %v311_v53 }
0x100c   :  { %345 = vperm.xlu1 %391, %v328_v59   ;;  %335 = vperm.xlu0 %390, %v328_v59  }
0x1010   :  { %392 = vset.pattern.permute.xlu0 %v481_v25 }
0x1087   :  { %v346_v3 = vpop.permute.xlu1 %345  ;;  %v336_v4 = vpop.permute.xlu0 %335 }
0x1088   :  { %v342_v7 = vmul.f32 %v341_v62, %v336_v4  ;;  %v352_v8 = vmul.f32 %v351_v63, %v346_v3 }
0x108a   :  { %v343_v9 = vadd.f32 %v342_v7, %v332_v0 }
0x108c   :  { %v353_v25 = vadd.f32 %v352_v8, %v343_v9 }
0x108e   :  { %355 = vst.msk [vmem:[#allocation2] sm:$0x3] %vm354_vm3, %v353_v25 }
0x108f   :  { %468 = shalt.err (!%p465_p4)
}
0x1090   :  { %365 = dma.vmem_to_hbm [thread:$0]  %s363_s29, 32, %s619_s2, [#allocation3]  }
0x1091   :  { %477 = dma.done.wait [#allocation3], 32  }
0x1092   :  { %478 = vsyncadd [#allocation3], 4294967264 }
0x1093   :  { %369 = vsyncpa [#allocation3], 1 }

</bundles_post_ra>
